<compile_context>
chip_gen: v7x
topology: tpu7x:2x2x1
jax: 0.10.0
libtpu: 0.0.40
codegen_flags: <defaults>
</compile_context>

<pallas_src>
import math

import jax
import jax.numpy as jnp
from jax.experimental import pallas as pl
from jax.experimental.pallas import tpu as pltpu


def _make_mha_kernel(num_heads: int, head_dim: int, scale: float,
                     zero_pad_slab: bool):
    def kernel(xq_ref, xkv_ref, wq_ref, bq_ref, wk_ref, bk_ref, wv_ref,
               bv_ref, wo_ref, bo_ref, o_ref, slab_ref):
        xq = xq_ref[0]    # (TQ, Fp) bf16 query tile
        xkv = xkv_ref[0]  # (S,  Fp) bf16 full sequence (self-attn: k = v = q)

        # 1) linear projections: bf16 operands on MXU, f32 accumulate,
        #    f32 bias add.  (Recomputed per q-tile so both grid axes stay
        #    "parallel" for megacore sharding; acceptable while TQ ~ S.)
        qp = jnp.dot(xq, wq_ref[...],
                     preferred_element_type=jnp.float32) + bq_ref[...]
        kp = jnp.dot(xkv, wk_ref[...],
                     preferred_element_type=jnp.float32) + bk_ref[...]
        vp = jnp.dot(xkv, wv_ref[...],
                     preferred_element_type=jnp.float32) + bv_ref[...]

        # Fold 1/sqrt(Dh) into q: TQ*F multiplies instead of TQ*S per head.
        qp = qp * scale

        if zero_pad_slab:  # static: only when model dim was lane-padded
            slab_ref[...] = jnp.zeros_like(slab_ref)

        # 2)+3) per-head attention.  Static unroll (small H).  For realistic
        # model dims Dh is 64/128 so these slices are lane-aligned.
        for h in range(num_heads):
            lo = h * head_dim
            q_h = qp[:, lo:lo + head_dim].astype(jnp.bfloat16)  # (TQ, Dh)
            k_h = kp[:, lo:lo + head_dim].astype(jnp.bfloat16)  # (S,  Dh)
            v_h = vp[:, lo:lo + head_dim].astype(jnp.bfloat16)  # (S,  Dh)

            # scores (TQ, S) = q_h @ k_h^T (scale already folded into q)
            s = jax.lax.dot_general(
                q_h, k_h, (((1,), (1,)), ((), ())),
                preferred_element_type=jnp.float32)

            # softmax statistics in f32; normalization deferred past p@v
            m = jnp.max(s, axis=-1, keepdims=True)
            p = jnp.exp(s - m)
            l = jnp.sum(p, axis=-1, keepdims=True)

            o_h = jnp.dot(p.astype(jnp.bfloat16), v_h,
                          preferred_element_type=jnp.float32)   # (TQ, Dh)
            o_h = o_h * pl.reciprocal(l, approx=True)           # EUP, not VPU div

            # head concat into the VMEM slab (columns [lo, lo+Dh))
            slab_ref[:, lo:lo + head_dim] = o_h.astype(jnp.bfloat16)

        # 4) single full-width output projection: (TQ, F) @ (F, F)
        out = jnp.dot(slab_ref[...], wo_ref[...],
                      preferred_element_type=jnp.float32) + bo_ref[...]
        o_ref[0] = out.astype(o_ref.dtype)

    return kernel


def _choose_q_tile(seq_len: int) -> int:
    for t in (512, 256, 128, 64, 32, 16, 8):
        if seq_len % t == 0:
            return t
    return seq_len  # small / odd sequence length: single full tile


def multiheaded_attention_block(x, params, num_heads):
    """Self-attention MultiHeadedAttentionBlock forward.

    x: (B, S, F) float32.  params: torch-layout weights (out,in), biases (F,).
    """
    B, S, F = x.shape
    head_dim = F // num_heads
    assert head_dim * num_heads == F, "model_dim must be divisible by num_heads"
    scale = 1.0 / math.sqrt(head_dim)

    # Lane-dense padding of the model dim to a multiple of 128.
    Fp = max(128, ((F + 127) // 128) * 128)
    pad = Fp - F

    def prep_w(w):  # torch (out,in) -> (in,out), zero-pad, cast bf16 (once)
        wt = jnp.asarray(w).T
        wt = jnp.pad(wt, ((0, pad), (0, pad)))
        return wt.astype(jnp.bfloat16)

    def prep_b(b):  # zero-pad, keep f32 (added after f32-accumulated matmul)
        return jnp.pad(jnp.asarray(b), (0, pad)).reshape(1, Fp).astype(jnp.float32)

    wq_t, wk_t, wv_t, wo_t = (prep_w(params[k]) for k in ("wq", "wk", "wv", "wo"))
    bq, bk, bv, bo = (prep_b(params[k]) for k in ("bq", "bk", "bv", "bo"))

    xp = jnp.pad(x, ((0, 0), (0, 0), (0, pad))).astype(jnp.bfloat16)

    tq = _choose_q_tile(S)
    n_q_tiles = S // tq

    xq_spec = pl.BlockSpec((1, tq, Fp), lambda b, qi: (b, qi, 0))
    xkv_spec = pl.BlockSpec((1, S, Fp), lambda b, qi: (b, 0, 0))
    w_spec = pl.BlockSpec((Fp, Fp), lambda b, qi: (0, 0))   # grid-invariant
    b_spec = pl.BlockSpec((1, Fp), lambda b, qi: (0, 0))    # grid-invariant
    out_spec = pl.BlockSpec((1, tq, Fp), lambda b, qi: (b, qi, 0))

    kernel = _make_mha_kernel(num_heads, head_dim, scale,
                              zero_pad_slab=(pad > 0))

    out_padded = pl.pallas_call(
        kernel,
        out_shape=jax.ShapeDtypeStruct((B, S, Fp), x.dtype),
        grid=(B, n_q_tiles),
        in_specs=[xq_spec, xkv_spec,
                  w_spec, b_spec,   # q_linear
                  w_spec, b_spec,   # k_linear
                  w_spec, b_spec,   # v_linear
                  w_spec, b_spec],  # out_linear
        out_specs=out_spec,
        scratch_shapes=[pltpu.VMEM((tq, Fp), jnp.bfloat16)],  # head-concat slab
        compiler_params=pltpu.CompilerParams(
            dimension_semantics=("parallel", "parallel"),
            vmem_limit_bytes=48 * 1024 * 1024),
    )(xp, xp, wq_t, bq, wk_t, bk, wv_t, bv, wo_t, bo)

    return out_padded[:, :, :F]


def _reference(x, params, num_heads):
    """Pure-JAX f32 reference mirroring the PyTorch forward (no masks, drp=0)."""
    B, S, F = x.shape
    head_dim = F // num_heads

    def lin(y, w, b):
        return y @ w.T + b

    q = lin(x, params["wq"], params["bq"])
    k = lin(x, params["wk"], params["bk"])
    v = lin(x, params["wv"], params["bv"])

    def split(y):  # (B,S,F) -> (B,H,S,Dh)
        return y.reshape(B, S, num_heads, head_dim).transpose(0, 2, 1, 3)

    q, k, v = split(q), split(k), split(v)
    scores = jnp.einsum("bhqd,bhkd->bhqk", q, k) / math.sqrt(head_dim)
    scores = jax.nn.softmax(scores, axis=-1)
    out = jnp.einsum("bhqk,bhkd->bhqd", scores, v)
    out = out.transpose(0, 2, 1, 3).reshape(B, S, F)
    return lin(out, params["wo"], params["bo"])


if __name__ == "__main__":
    # Small shapes consistent with the module: (batch, seq, model_dim)
    B, S, MODEL_DIM, NUM_HEADS = 2, 8, 32, 4

    key = jax.random.PRNGKey(0)
    keys = jax.random.split(key, 9)

    x = jax.random.normal(keys[0], (B, S, MODEL_DIM), jnp.float32)

    bound = 1.0 / math.sqrt(MODEL_DIM)  # torch.nn.Linear default init range
    def init_w(k):
        return jax.random.uniform(k, (MODEL_DIM, MODEL_DIM), jnp.float32,
                                  -bound, bound)
    def init_b(k):
        return jax.random.uniform(k, (MODEL_DIM,), jnp.float32, -bound, bound)

    params = {
        "wq": init_w(keys[1]), "bq": init_b(keys[2]),
        "wk": init_w(keys[3]), "bk": init_b(keys[4]),
        "wv": init_w(keys[5]), "bv": init_b(keys[6]),
        "wo": init_w(keys[7]), "bo": init_b(keys[8]),
    }

    out = multiheaded_attention_block(x, params, NUM_HEADS)
    out = jax.block_until_ready(out)

    ref = _reference(x, params, NUM_HEADS)
    assert out.shape == (B, S, MODEL_DIM)
    max_err = float(jnp.max(jnp.abs(out - ref)))
    # bf16 MXU operands + approx reciprocal: bf16-level tolerance.
    assert jnp.allclose(out, ref, atol=2e-2, rtol=2e-2), \
        f"mismatch vs reference (max abs err {max_err})"

    print("KERNEL_OK")
</pallas_src>

<mosaic_0001>
module attributes {stable_mosaic.version = 11 : i64} {
  func.func @kernel(%arg0: i32, %arg1: i32, %arg2: memref<1x8x128xbf16, #tpu.memory_space<vmem>>, %arg3: memref<1x8x128xbf16, #tpu.memory_space<vmem>>, %arg4: memref<128x128xbf16, #tpu.memory_space<vmem>>, %arg5: memref<1x128xf32, #tpu.memory_space<vmem>>, %arg6: memref<128x128xbf16, #tpu.memory_space<vmem>>, %arg7: memref<1x128xf32, #tpu.memory_space<vmem>>, %arg8: memref<128x128xbf16, #tpu.memory_space<vmem>>, %arg9: memref<1x128xf32, #tpu.memory_space<vmem>>, %arg10: memref<128x128xbf16, #tpu.memory_space<vmem>>, %arg11: memref<1x128xf32, #tpu.memory_space<vmem>>, %arg12: memref<1x8x128xf32, #tpu.memory_space<vmem>>, %arg13: memref<8x128xbf16, #tpu.memory_space<vmem>>) attributes {dimension_semantics = [#tpu.dimension_semantics<parallel>, #tpu.dimension_semantics<parallel>], iteration_bounds = array<i64: 2, 1>, scalar_prefetch = 0 : i64, scratch_operands = 1 : i64, tpu.core_type = #tpu.core_type<tc>, window_params = [{transform_indices = @transform_0, window_bounds = array<i64: 1, 8, 128>}, {transform_indices = @transform_1, window_bounds = array<i64: 1, 8, 128>}, {pipeline_mode = #tpu.pipeline_mode<synchronous>, transform_indices = @transform_2, window_bounds = array<i64: 128, 128>}, {pipeline_mode = #tpu.pipeline_mode<synchronous>, transform_indices = @transform_3, window_bounds = array<i64: 1, 128>}, {pipeline_mode = #tpu.pipeline_mode<synchronous>, transform_indices = @transform_4, window_bounds = array<i64: 128, 128>}, {pipeline_mode = #tpu.pipeline_mode<synchronous>, transform_indices = @transform_5, window_bounds = array<i64: 1, 128>}, {pipeline_mode = #tpu.pipeline_mode<synchronous>, transform_indices = @transform_6, window_bounds = array<i64: 128, 128>}, {pipeline_mode = #tpu.pipeline_mode<synchronous>, transform_indices = @transform_7, window_bounds = array<i64: 1, 128>}, {pipeline_mode = #tpu.pipeline_mode<synchronous>, transform_indices = @transform_8, window_bounds = array<i64: 128, 128>}, {pipeline_mode = #tpu.pipeline_mode<synchronous>, transform_indices = @transform_9, window_bounds = array<i64: 1, 128>}, {transform_indices = @transform_10, window_bounds = array<i64: 1, 8, 128>}]} {
    %c0 = arith.constant 0 : index
    %c0_0 = arith.constant 0 : index
    %c0_1 = arith.constant 0 : index
    %0 = vector.load %arg2[%c0, %c0_0, %c0_1] : memref<1x8x128xbf16, #tpu.memory_space<vmem>>, vector<1x8x128xbf16>
    %1 = vector.shape_cast %0 : vector<1x8x128xbf16> to vector<8x128xbf16>
    %c0_2 = arith.constant 0 : index
    %c0_3 = arith.constant 0 : index
    %c0_4 = arith.constant 0 : index
    %2 = vector.load %arg3[%c0_2, %c0_3, %c0_4] : memref<1x8x128xbf16, #tpu.memory_space<vmem>>, vector<1x8x128xbf16>
    %3 = vector.shape_cast %2 : vector<1x8x128xbf16> to vector<8x128xbf16>
    %c0_5 = arith.constant 0 : index
    %c0_6 = arith.constant 0 : index
    %4 = vector.load %arg4[%c0_5, %c0_6] : memref<128x128xbf16, #tpu.memory_space<vmem>>, vector<128x128xbf16>
    %cst = arith.constant dense<0.000000e+00> : vector<8x128xf32>
    %5 = tpu.matmul %1, %4, %cst {dimension_numbers = #tpu.dot_dimension_numbers<[1], [0], [0], [1], [0, 0, 1, 1], [], []>} : vector<8x128xbf16>, vector<128x128xbf16>, vector<8x128xf32> -> vector<8x128xf32>
    %c0_7 = arith.constant 0 : index
    %c0_8 = arith.constant 0 : index
    %6 = vector.load %arg5[%c0_7, %c0_8] : memref<1x128xf32, #tpu.memory_space<vmem>>, vector<1x128xf32>
    %7 = vector.broadcast %6 : vector<1x128xf32> to vector<8x128xf32>
    %8 = arith.addf %5, %7 : vector<8x128xf32>
    %c0_9 = arith.constant 0 : index
    %c0_10 = arith.constant 0 : index
    %9 = vector.load %arg6[%c0_9, %c0_10] : memref<128x128xbf16, #tpu.memory_space<vmem>>, vector<128x128xbf16>
    %cst_11 = arith.constant dense<0.000000e+00> : vector<8x128xf32>
    %10 = tpu.matmul %3, %9, %cst_11 {dimension_numbers = #tpu.dot_dimension_numbers<[1], [0], [0], [1], [0, 0, 1, 1], [], []>} : vector<8x128xbf16>, vector<128x128xbf16>, vector<8x128xf32> -> vector<8x128xf32>
    %c0_12 = arith.constant 0 : index
    %c0_13 = arith.constant 0 : index
    %11 = vector.load %arg7[%c0_12, %c0_13] : memref<1x128xf32, #tpu.memory_space<vmem>>, vector<1x128xf32>
    %12 = vector.broadcast %11 : vector<1x128xf32> to vector<8x128xf32>
    %13 = arith.addf %10, %12 : vector<8x128xf32>
    %c0_14 = arith.constant 0 : index
    %c0_15 = arith.constant 0 : index
    %14 = vector.load %arg8[%c0_14, %c0_15] : memref<128x128xbf16, #tpu.memory_space<vmem>>, vector<128x128xbf16>
    %cst_16 = arith.constant dense<0.000000e+00> : vector<8x128xf32>
    %15 = tpu.matmul %3, %14, %cst_16 {dimension_numbers = #tpu.dot_dimension_numbers<[1], [0], [0], [1], [0, 0, 1, 1], [], []>} : vector<8x128xbf16>, vector<128x128xbf16>, vector<8x128xf32> -> vector<8x128xf32>
    %c0_17 = arith.constant 0 : index
    %c0_18 = arith.constant 0 : index
    %16 = vector.load %arg9[%c0_17, %c0_18] : memref<1x128xf32, #tpu.memory_space<vmem>>, vector<1x128xf32>
    %17 = vector.broadcast %16 : vector<1x128xf32> to vector<8x128xf32>
    %18 = arith.addf %15, %17 : vector<8x128xf32>
    %cst_19 = arith.constant 0.353553385 : f32
    %19 = vector.broadcast %cst_19 : f32 to vector<8x128xf32>
    %20 = arith.mulf %8, %19 : vector<8x128xf32>
    %cst_20 = arith.constant 0.000000e+00 : bf16
    %21 = vector.broadcast %cst_20 : bf16 to vector<8x128xbf16>
    %c0_21 = arith.constant 0 : index
    %c0_22 = arith.constant 0 : index
    %22 = vector.load %arg13[%c0_21, %c0_22] : memref<8x128xbf16, #tpu.memory_space<vmem>>, vector<8x128xbf16>
    tpu.vector_store %arg13[%c0_21, %c0_22], %21 {strides = array<i32>} : memref<8x128xbf16, #tpu.memory_space<vmem>>, vector<8x128xbf16>,
    %23 = vector.extract_strided_slice %20 {offsets = [0, 0], sizes = [8, 8], strides = [1, 1]} : vector<8x128xf32> to vector<8x8xf32>
    %24 = arith.truncf %23 : vector<8x8xf32> to vector<8x8xbf16>
    %25 = vector.extract_strided_slice %13 {offsets = [0, 0], sizes = [8, 8], strides = [1, 1]} : vector<8x128xf32> to vector<8x8xf32>
    %26 = arith.truncf %25 : vector<8x8xf32> to vector<8x8xbf16>
    %27 = vector.extract_strided_slice %18 {offsets = [0, 0], sizes = [8, 8], strides = [1, 1]} : vector<8x128xf32> to vector<8x8xf32>
    %28 = arith.truncf %27 : vector<8x8xf32> to vector<8x8xbf16>
    %cst_23 = arith.constant dense<0.000000e+00> : vector<8x8xf32>
    %29 = tpu.matmul %24, %26, %cst_23 {dimension_numbers = #tpu.dot_dimension_numbers<[1], [1], [0], [0], [0, 0, 1, 0], [], []>} : vector<8x8xbf16>, vector<8x8xbf16>, vector<8x8xf32> -> vector<8x8xf32>
    %cst_24 = arith.constant dense<0xFF800000> : vector<8xf32>
    %30 = vector.multi_reduction <maximumf>, %29, %cst_24 [1] : vector<8x8xf32> to vector<8xf32>
    %31 = vector.shape_cast %30 : vector<8xf32> to vector<8x1xf32>
    %32 = vector.broadcast %31 : vector<8x1xf32> to vector<8x8xf32>
    %33 = arith.subf %29, %32 : vector<8x8xf32>
    %34 = math.exp %33 : vector<8x8xf32>
    %cst_25 = arith.constant dense<0.000000e+00> : vector<8xf32>
    %35 = vector.multi_reduction <add>, %34, %cst_25 [1] : vector<8x8xf32> to vector<8xf32>
    %36 = vector.shape_cast %35 : vector<8xf32> to vector<8x1xf32>
    %37 = arith.truncf %34 : vector<8x8xf32> to vector<8x8xbf16>
    %cst_26 = arith.constant dense<0.000000e+00> : vector<8x8xf32>
    %38 = tpu.matmul %37, %28, %cst_26 {dimension_numbers = #tpu.dot_dimension_numbers<[1], [0], [0], [1], [0, 0, 1, 1], [], []>} : vector<8x8xbf16>, vector<8x8xbf16>, vector<8x8xf32> -> vector<8x8xf32>
    %39 = tpu.reciprocal %36 {approx = true} : vector<8x1xf32> -> vector<8x1xf32>
    %40 = vector.broadcast %39 : vector<8x1xf32> to vector<8x8xf32>
    %41 = arith.mulf %38, %40 : vector<8x8xf32>
    %42 = arith.truncf %41 : vector<8x8xf32> to vector<8x8xbf16>
    %c0_27 = arith.constant 0 : index
    %c0_28 = arith.constant 0 : index
    %43 = vector.load %arg13[%c0_27, %c0_28] : memref<8x128xbf16, #tpu.memory_space<vmem>>, vector<8x8xbf16>
    tpu.vector_store %arg13[%c0_27, %c0_28], %42 {strides = array<i32>} : memref<8x128xbf16, #tpu.memory_space<vmem>>, vector<8x8xbf16>,
    %44 = vector.extract_strided_slice %20 {offsets = [0, 8], sizes = [8, 8], strides = [1, 1]} : vector<8x128xf32> to vector<8x8xf32>
    %45 = arith.truncf %44 : vector<8x8xf32> to vector<8x8xbf16>
    %46 = vector.extract_strided_slice %13 {offsets = [0, 8], sizes = [8, 8], strides = [1, 1]} : vector<8x128xf32> to vector<8x8xf32>
    %47 = arith.truncf %46 : vector<8x8xf32> to vector<8x8xbf16>
    %48 = vector.extract_strided_slice %18 {offsets = [0, 8], sizes = [8, 8], strides = [1, 1]} : vector<8x128xf32> to vector<8x8xf32>
    %49 = arith.truncf %48 : vector<8x8xf32> to vector<8x8xbf16>
    %cst_29 = arith.constant dense<0.000000e+00> : vector<8x8xf32>
    %50 = tpu.matmul %45, %47, %cst_29 {dimension_numbers = #tpu.dot_dimension_numbers<[1], [1], [0], [0], [0, 0, 1, 0], [], []>} : vector<8x8xbf16>, vector<8x8xbf16>, vector<8x8xf32> -> vector<8x8xf32>
    %cst_30 = arith.constant dense<0xFF800000> : vector<8xf32>
    %51 = vector.multi_reduction <maximumf>, %50, %cst_30 [1] : vector<8x8xf32> to vector<8xf32>
    %52 = vector.shape_cast %51 : vector<8xf32> to vector<8x1xf32>
    %53 = vector.broadcast %52 : vector<8x1xf32> to vector<8x8xf32>
    %54 = arith.subf %50, %53 : vector<8x8xf32>
    %55 = math.exp %54 : vector<8x8xf32>
    %cst_31 = arith.constant dense<0.000000e+00> : vector<8xf32>
    %56 = vector.multi_reduction <add>, %55, %cst_31 [1] : vector<8x8xf32> to vector<8xf32>
    %57 = vector.shape_cast %56 : vector<8xf32> to vector<8x1xf32>
    %58 = arith.truncf %55 : vector<8x8xf32> to vector<8x8xbf16>
    %cst_32 = arith.constant dense<0.000000e+00> : vector<8x8xf32>
    %59 = tpu.matmul %58, %49, %cst_32 {dimension_numbers = #tpu.dot_dimension_numbers<[1], [0], [0], [1], [0, 0, 1, 1], [], []>} : vector<8x8xbf16>, vector<8x8xbf16>, vector<8x8xf32> -> vector<8x8xf32>
    %60 = tpu.reciprocal %57 {approx = true} : vector<8x1xf32> -> vector<8x1xf32>
    %61 = vector.broadcast %60 : vector<8x1xf32> to vector<8x8xf32>
    %62 = arith.mulf %59, %61 : vector<8x8xf32>
    %63 = arith.truncf %62 : vector<8x8xf32> to vector<8x8xbf16>
    %c0_33 = arith.constant 0 : index
    %c8 = arith.constant 8 : index
    %64 = vector.load %arg13[%c0_33, %c8] : memref<8x128xbf16, #tpu.memory_space<vmem>>, vector<8x8xbf16>
    tpu.vector_store %arg13[%c0_33, %c8], %63 {strides = array<i32>} : memref<8x128xbf16, #tpu.memory_space<vmem>>, vector<8x8xbf16>,
    %65 = vector.extract_strided_slice %20 {offsets = [0, 16], sizes = [8, 8], strides = [1, 1]} : vector<8x128xf32> to vector<8x8xf32>
    %66 = arith.truncf %65 : vector<8x8xf32> to vector<8x8xbf16>
    %67 = vector.extract_strided_slice %13 {offsets = [0, 16], sizes = [8, 8], strides = [1, 1]} : vector<8x128xf32> to vector<8x8xf32>
    %68 = arith.truncf %67 : vector<8x8xf32> to vector<8x8xbf16>
    %69 = vector.extract_strided_slice %18 {offsets = [0, 16], sizes = [8, 8], strides = [1, 1]} : vector<8x128xf32> to vector<8x8xf32>
    %70 = arith.truncf %69 : vector<8x8xf32> to vector<8x8xbf16>
    %cst_34 = arith.constant dense<0.000000e+00> : vector<8x8xf32>
    %71 = tpu.matmul %66, %68, %cst_34 {dimension_numbers = #tpu.dot_dimension_numbers<[1], [1], [0], [0], [0, 0, 1, 0], [], []>} : vector<8x8xbf16>, vector<8x8xbf16>, vector<8x8xf32> -> vector<8x8xf32>
    %cst_35 = arith.constant dense<0xFF800000> : vector<8xf32>
    %72 = vector.multi_reduction <maximumf>, %71, %cst_35 [1] : vector<8x8xf32> to vector<8xf32>
    %73 = vector.shape_cast %72 : vector<8xf32> to vector<8x1xf32>
    %74 = vector.broadcast %73 : vector<8x1xf32> to vector<8x8xf32>
    %75 = arith.subf %71, %74 : vector<8x8xf32>
    %76 = math.exp %75 : vector<8x8xf32>
    %cst_36 = arith.constant dense<0.000000e+00> : vector<8xf32>
    %77 = vector.multi_reduction <add>, %76, %cst_36 [1] : vector<8x8xf32> to vector<8xf32>
    %78 = vector.shape_cast %77 : vector<8xf32> to vector<8x1xf32>
    %79 = arith.truncf %76 : vector<8x8xf32> to vector<8x8xbf16>
    %cst_37 = arith.constant dense<0.000000e+00> : vector<8x8xf32>
    %80 = tpu.matmul %79, %70, %cst_37 {dimension_numbers = #tpu.dot_dimension_numbers<[1], [0], [0], [1], [0, 0, 1, 1], [], []>} : vector<8x8xbf16>, vector<8x8xbf16>, vector<8x8xf32> -> vector<8x8xf32>
    %81 = tpu.reciprocal %78 {approx = true} : vector<8x1xf32> -> vector<8x1xf32>
    %82 = vector.broadcast %81 : vector<8x1xf32> to vector<8x8xf32>
    %83 = arith.mulf %80, %82 : vector<8x8xf32>
    %84 = arith.truncf %83 : vector<8x8xf32> to vector<8x8xbf16>
    %c0_38 = arith.constant 0 : index
    %c16 = arith.constant 16 : index
    %85 = vector.load %arg13[%c0_38, %c16] : memref<8x128xbf16, #tpu.memory_space<vmem>>, vector<8x8xbf16>
    tpu.vector_store %arg13[%c0_38, %c16], %84 {strides = array<i32>} : memref<8x128xbf16, #tpu.memory_space<vmem>>, vector<8x8xbf16>,
    %86 = vector.extract_strided_slice %20 {offsets = [0, 24], sizes = [8, 8], strides = [1, 1]} : vector<8x128xf32> to vector<8x8xf32>
    %87 = arith.truncf %86 : vector<8x8xf32> to vector<8x8xbf16>
    %88 = vector.extract_strided_slice %13 {offsets = [0, 24], sizes = [8, 8], strides = [1, 1]} : vector<8x128xf32> to vector<8x8xf32>
    %89 = arith.truncf %88 : vector<8x8xf32> to vector<8x8xbf16>
    %90 = vector.extract_strided_slice %18 {offsets = [0, 24], sizes = [8, 8], strides = [1, 1]} : vector<8x128xf32> to vector<8x8xf32>
    %91 = arith.truncf %90 : vector<8x8xf32> to vector<8x8xbf16>
    %cst_39 = arith.constant dense<0.000000e+00> : vector<8x8xf32>
    %92 = tpu.matmul %87, %89, %cst_39 {dimension_numbers = #tpu.dot_dimension_numbers<[1], [1], [0], [0], [0, 0, 1, 0], [], []>} : vector<8x8xbf16>, vector<8x8xbf16>, vector<8x8xf32> -> vector<8x8xf32>
    %cst_40 = arith.constant dense<0xFF800000> : vector<8xf32>
    %93 = vector.multi_reduction <maximumf>, %92, %cst_40 [1] : vector<8x8xf32> to vector<8xf32>
    %94 = vector.shape_cast %93 : vector<8xf32> to vector<8x1xf32>
    %95 = vector.broadcast %94 : vector<8x1xf32> to vector<8x8xf32>
    %96 = arith.subf %92, %95 : vector<8x8xf32>
    %97 = math.exp %96 : vector<8x8xf32>
    %cst_41 = arith.constant dense<0.000000e+00> : vector<8xf32>
    %98 = vector.multi_reduction <add>, %97, %cst_41 [1] : vector<8x8xf32> to vector<8xf32>
    %99 = vector.shape_cast %98 : vector<8xf32> to vector<8x1xf32>
    %100 = arith.truncf %97 : vector<8x8xf32> to vector<8x8xbf16>
    %cst_42 = arith.constant dense<0.000000e+00> : vector<8x8xf32>
    %101 = tpu.matmul %100, %91, %cst_42 {dimension_numbers = #tpu.dot_dimension_numbers<[1], [0], [0], [1], [0, 0, 1, 1], [], []>} : vector<8x8xbf16>, vector<8x8xbf16>, vector<8x8xf32> -> vector<8x8xf32>
    %102 = tpu.reciprocal %99 {approx = true} : vector<8x1xf32> -> vector<8x1xf32>
    %103 = vector.broadcast %102 : vector<8x1xf32> to vector<8x8xf32>
    %104 = arith.mulf %101, %103 : vector<8x8xf32>
    %105 = arith.truncf %104 : vector<8x8xf32> to vector<8x8xbf16>
    %c0_43 = arith.constant 0 : index
    %c24 = arith.constant 24 : index
    %106 = vector.load %arg13[%c0_43, %c24] : memref<8x128xbf16, #tpu.memory_space<vmem>>, vector<8x8xbf16>
    tpu.vector_store %arg13[%c0_43, %c24], %105 {strides = array<i32>} : memref<8x128xbf16, #tpu.memory_space<vmem>>, vector<8x8xbf16>,
    %c0_44 = arith.constant 0 : index
    %c0_45 = arith.constant 0 : index
    %107 = vector.load %arg13[%c0_44, %c0_45] : memref<8x128xbf16, #tpu.memory_space<vmem>>, vector<8x128xbf16>
    %c0_46 = arith.constant 0 : index
    %c0_47 = arith.constant 0 : index
    %108 = vector.load %arg10[%c0_46, %c0_47] : memref<128x128xbf16, #tpu.memory_space<vmem>>, vector<128x128xbf16>
    %cst_48 = arith.constant dense<0.000000e+00> : vector<8x128xf32>
    %109 = tpu.matmul %107, %108, %cst_48 {dimension_numbers = #tpu.dot_dimension_numbers<[1], [0], [0], [1], [0, 0, 1, 1], [], []>} : vector<8x128xbf16>, vector<128x128xbf16>, vector<8x128xf32> -> vector<8x128xf32>
    %c0_49 = arith.constant 0 : index
    %c0_50 = arith.constant 0 : index
    %110 = vector.load %arg11[%c0_49, %c0_50] : memref<1x128xf32, #tpu.memory_space<vmem>>, vector<1x128xf32>
    %111 = vector.broadcast %110 : vector<1x128xf32> to vector<8x128xf32>
    %112 = arith.addf %109, %111 : vector<8x128xf32>
    %c0_51 = arith.constant 0 : index
    %c0_52 = arith.constant 0 : index
    %c0_53 = arith.constant 0 : index
    %113 = vector.load %arg12[%c0_51, %c0_52, %c0_53] : memref<1x8x128xf32, #tpu.memory_space<vmem>>, vector<1x8x128xf32>
    %114 = vector.shape_cast %113 : vector<1x8x128xf32> to vector<8x128xf32>
    %115 = vector.shape_cast %112 : vector<8x128xf32> to vector<1x8x128xf32>
    tpu.vector_store %arg12[%c0_51, %c0_52, %c0_53], %115 {strides = array<i32>} : memref<1x8x128xf32, #tpu.memory_space<vmem>>, vector<1x8x128xf32>,
    return
  }
  func.func @transform_0(%arg0: i32, %arg1: i32) -> (i32, i32, i32) {
    %c0_i32 = arith.constant 0 : i32
    %c0_i32_0 = arith.constant 0 : i32
    return %arg0, %arg1, %c0_i32 : i32, i32, i32
  }
  func.func @transform_1(%arg0: i32, %arg1: i32) -> (i32, i32, i32) {
    %c0_i32 = arith.constant 0 : i32
    %c0_i32_0 = arith.constant 0 : i32
    %c0_i32_1 = arith.constant 0 : i32
    return %arg0, %c0_i32, %c0_i32_0 : i32, i32, i32
  }
  func.func @transform_2(%arg0: i32, %arg1: i32) -> (i32, i32) {
    %c0_i32 = arith.constant 0 : i32
    %c0_i32_0 = arith.constant 0 : i32
    %c0_i32_1 = arith.constant 0 : i32
    return %c0_i32, %c0_i32_0 : i32, i32
  }
  func.func @transform_3(%arg0: i32, %arg1: i32) -> (i32, i32) {
    %c0_i32 = arith.constant 0 : i32
    %c0_i32_0 = arith.constant 0 : i32
    %c0_i32_1 = arith.constant 0 : i32
    return %c0_i32, %c0_i32_0 : i32, i32
  }
  func.func @transform_4(%arg0: i32, %arg1: i32) -> (i32, i32) {
    %c0_i32 = arith.constant 0 : i32
    %c0_i32_0 = arith.constant 0 : i32
    %c0_i32_1 = arith.constant 0 : i32
    return %c0_i32, %c0_i32_0 : i32, i32
  }
  func.func @transform_5(%arg0: i32, %arg1: i32) -> (i32, i32) {
    %c0_i32 = arith.constant 0 : i32
    %c0_i32_0 = arith.constant 0 : i32
    %c0_i32_1 = arith.constant 0 : i32
    return %c0_i32, %c0_i32_0 : i32, i32
  }
  func.func @transform_6(%arg0: i32, %arg1: i32) -> (i32, i32) {
    %c0_i32 = arith.constant 0 : i32
    %c0_i32_0 = arith.constant 0 : i32
    %c0_i32_1 = arith.constant 0 : i32
    return %c0_i32, %c0_i32_0 : i32, i32
  }
  func.func @transform_7(%arg0: i32, %arg1: i32) -> (i32, i32) {
    %c0_i32 = arith.constant 0 : i32
    %c0_i32_0 = arith.constant 0 : i32
    %c0_i32_1 = arith.constant 0 : i32
    return %c0_i32, %c0_i32_0 : i32, i32
  }
  func.func @transform_8(%arg0: i32, %arg1: i32) -> (i32, i32) {
    %c0_i32 = arith.constant 0 : i32
    %c0_i32_0 = arith.constant 0 : i32
    %c0_i32_1 = arith.constant 0 : i32
    return %c0_i32, %c0_i32_0 : i32, i32
  }
  func.func @transform_9(%arg0: i32, %arg1: i32) -> (i32, i32) {
    %c0_i32 = arith.constant 0 : i32
    %c0_i32_0 = arith.constant 0 : i32
    %c0_i32_1 = arith.constant 0 : i32
    return %c0_i32, %c0_i32_0 : i32, i32
  }
  func.func @transform_10(%arg0: i32, %arg1: i32) -> (i32, i32, i32) {
    %c0_i32 = arith.constant 0 : i32
    %c0_i32_0 = arith.constant 0 : i32
    return %arg0, %arg1, %c0_i32 : i32, i32, i32
  }
}

</mosaic_0001>

<bundles_post_ra>
// kernel: tpu_custom_call.1
= control target key start
LH: loop header
LB: loop body
LE: loop exit
PB: predicated region body
PF: predicated region fallthrough
CT: control target
= control target key end

     0   :  { %s2809_s0 = inlined_call_operand.hbm [shape: bf16[2,8,128], index: 0, kind: input, shape index: {}]   ;;  %s2810_s1 = inlined_call_operand.hbm [shape: bf16[2,8,128], index: 1, kind: input, shape index: {}]   ;;  %s2811_s2 = inlined_call_operand.hbm [shape: bf16[128,128], index: 2, kind: input, shape index: {}]   ;;  %s2812_s3 = inlined_call_operand.vmem [shape: f32[1,128], index: 3, kind: input, shape index: {}]   ;;  %s2813_s4 = inlined_call_operand.hbm [shape: bf16[128,128], index: 4, kind: input, shape index: {}]   ;;  %s2814_s5 = inlined_call_operand.vmem [shape: f32[1,128], index: 5, kind: input, shape index: {}]   ;;  %s2815_s6 = inlined_call_operand.hbm [shape: bf16[128,128], index: 6, kind: input, shape index: {}]   ;;  %s2816_s7 = inlined_call_operand.vmem [shape: f32[1,128], index: 7, kind: input, shape index: {}]   ;;  %s2817_s8 = inlined_call_operand.hbm [shape: bf16[128,128], index: 8, kind: input, shape index: {}]   ;;  %s2818_s9 = inlined_call_operand.vmem [shape: f32[1,128], index: 9, kind: input, shape index: {}]   ;;  %s2819_s10 = inlined_call_operand.hbm [shape: f32[2,8,128], index: 10, kind: output, shape index: {}]  }
   0x1   :  { %2826 = sst [smem:[#allocation23_spill]] %s2811_s2 }
   0x2   :  { %2827 = sst [smem:[#allocation24_spill]] %s2813_s4 }
   0x3   :  { %2828 = sst [smem:[#allocation25_spill]] %s2815_s6 }
   0x4   :  { %2829 = sst [smem:[#allocation26_spill]] %s2816_s7 }
   0x5   :  { %2830 = sst [smem:[#allocation27_spill]] %s2817_s8 }
   0x6   :  { %2831 = sst [smem:[#allocation28_spill]] %s2818_s9 }
   0x7   :  { %2832 = sst [smem:[#allocation29_spill]] %s2819_s10 }
   0x8   :  { %15 = vsyncpa [#allocation4], 0 }
   0x9   :  { %17 = vsyncpa [#allocation4 + $0x1], 0 }
   0xa   :  { %18 = vsyncpa [#allocation7], 0 }
   0xb   :  { %20 = vsyncpa [#allocation7 + $0x1], 0 }
   0xc   :  { %21 = vsyncpa [#allocation10], 0 }
   0xd   :  { %22 = vsyncpa [#allocation13], 0 }
   0xe   :  { %23 = vsyncpa [#allocation5], 0 }
   0xf   :  { %25 = vsyncpa [#allocation5 + $0x1], 0  ;;  %s2332_s13 = smov 0   ;;  %s2334_s14 = smov 0  }
  0x10   :  { %s2336_s15 = smov 0   ;;  %s2338_s16 = smov 0  }
  0x11   :  { %s2340_s17 = smov 0   ;;  %s2342_s18 = smov 0  }
  0x12 LB: > { %2833 = sst [smem:[#allocation21_spill]] %s2249_s16  ;;  %s2363_s19 = sadd.s32 4294967295, %s2257_s18   ;;  %s2257_s18 = sphi %s2342_s18, %s31_s18   ;;  %s2253_s17 = sphi %s2340_s17, %s2868_s17   ;;  %s2249_s16 = sphi %s2338_s16, %s2867_s16   ;;  %s2245_s15 = sphi %s2336_s15, %s2866_s15   ;;  %s2241_s14 = sphi %s2334_s14, %s2865_s14   ;;  %s2237_s13 = sphi %s2332_s13, %s2864_s13  }
  0x13   : > { %p1568_p0 = scmp.ge.s32.totalorder %s2257_s18, 1  ;;  %p2821_p1 = scmp.eq.s32.totalorder %s2363_s19, 0 }
  0x14   : > { %p298_p2 = scmp.lt.s32.totalorder %s2257_s18, 3  ;;  %s2259_s21 = smov [#allocation8]  }
  0x15   : > { %s310_s22 = sshll.u32 %s2259_s21, 4  ;;  %s2260_s24 = smov [#allocation9]   ;;  %s2372_s22 = int_to_ptr.vmem [resolvable:$true] %s310_s22 }
  0x16   : > { %p2368_p3 = pnand %p1568_p0, %p298_p2  ;;  %s326_s25 = sshll.u32 %s2260_s24, 4  ;;  %s2383_s25 = int_to_ptr.vmem [resolvable:$true] %s326_s25 }
  0x17   : > { %s2261_s26 = smov [#allocation11]   ;;  %s2836_s2 = sld [smem:[#allocation23_spill]] }
  0x18   : > { %s2834_s20 = scalar_select %p2368_p3, 1, 0 }
  0x19   : > { %p1842_p4 = pneg %p2368_p3  ;;  %s2385_s27 = sshll.u32 %s2261_s26, 4  ;;  %s343_s27 = int_to_ptr.vmem [resolvable:$true] %s2385_s27 }
  0x1b   : > { %p2379_p6 = pnand %p1842_p4, %p2821_p1 }
  0x1d   : > { %s1987_s30 = scalar_lea.hbm %s2836_s2, 1024  ;;  %p2395_p8 = pneg %p2379_p6 }
  0x1e   : > { %p1988_p7 = scmp.ne.s32.totalorder %s2836_s2, %s1987_s30  ;;  %p1994_p11 = scmp.lt.u32.totalorder %s1987_s30, %s2836_s2 }
  0x20   : > { %p1990_p9 = pnand %p2395_p8, %p1988_p7 }
  0x22   : > { %p1991_p10 = pneg %p1990_p9 }
  0x24   : > { %p1996_p12 = pnand %p1994_p11, %p1991_p10 }
  0x26   : > { %1999 = shalt.err (!%p1996_p12)
}
  0x27   : > { %s2000_s28 = scalar_lea.vmem %s2372_s22, 1024  ;;  %p2008_p4 = scmp.lt.s32.totalorder %s2372_s22, %s2372_s22 }
  0x28   : > { %p2001_p13 = scmp.ne.s32.totalorder %s2372_s22, %s2000_s28  ;;  %p2009_p5 = scmp.lt.s32.totalorder %s2000_s28, %s2000_s28 }
  0x2a   : > { %p2003_p0 = pnand %p2001_p13, %p2395_p8  ;;  %p2010_p7 = por %p2009_p5, %p2008_p4 }
  0x2c   : > { %p2004_p2 = pneg %p2003_p0 }
  0x2e   : > { %p2011_p9 = pnand %p2010_p7, %p2004_p2 }
  0x30   : > { %2014 = shalt.err (!%p2011_p9)
}
  0x31   : > { %s2262_s29 = smov 64   ;;  %s2263_s30 = smov 4  }
  0x32   : > { %1845 = dma.hbm_to_vmem [thread:$0]  (!%p2379_p6), %s2836_s2, 1024, %s2372_s22, [#allocation7], %s2262_s29, %s2262_s29, %s2263_s30  }
  0x33   : > { %s2838_s4 = sld [smem:[#allocation24_spill]] }
  0x39   : > { %s2015_s28 = scalar_lea.hbm %s2838_s4, 1024 }
  0x3a   : > { %p2016_p5 = scmp.ne.s32.totalorder %s2838_s4, %s2015_s28  ;;  %p2022_p12 = scmp.lt.u32.totalorder %s2015_s28, %s2838_s4 }
  0x3c   : > { %p2018_p10 = pnand %p2016_p5, %p2395_p8 }
  0x3e   : > { %p2019_p11 = pneg %p2018_p10 }
  0x40   : > { %p2024_p13 = pnand %p2022_p12, %p2019_p11 }
  0x42   : > { %2027 = shalt.err (!%p2024_p13)
}
  0x43   : > { %s2028_s22 = scalar_lea.vmem %s2383_s25, 1024  ;;  %p2036_p7 = scmp.lt.s32.totalorder %s2383_s25, %s2383_s25 }
  0x44   : > { %p2029_p0 = scmp.ne.s32.totalorder %s2383_s25, %s2028_s22  ;;  %p2037_p9 = scmp.lt.s32.totalorder %s2028_s22, %s2028_s22 }
  0x46   : > { %p2031_p2 = pnand %p2029_p0, %p2395_p8  ;;  %p2038_p5 = por %p2037_p9, %p2036_p7 }
  0x48   : > { %p2032_p4 = pneg %p2031_p2 }
  0x4a   : > { %p2039_p10 = pnand %p2038_p5, %p2032_p4 }
  0x4c   : > { %2042 = shalt.err (!%p2039_p10)
}
  0x4d   : > { %1848 = dma.hbm_to_vmem [thread:$0]  (!%p2379_p6), %s2838_s4, 1024, %s2383_s25, [#allocation10], %s2262_s29, %s2262_s29, %s2263_s30  }
  0x4e   : > { %s2839_s6 = sld [smem:[#allocation25_spill]] }
  0x54   : > { %s2043_s11 = scalar_lea.hbm %s2839_s6, 1024 }
  0x55   : > { %p2044_p11 = scmp.ne.s32.totalorder %s2839_s6, %s2043_s11  ;;  %p2050_p0 = scmp.lt.u32.totalorder %s2043_s11, %s2839_s6 }
  0x57   : > { %p2046_p12 = pnand %p2044_p11, %p2395_p8 }
  0x59   : > { %p2047_p13 = pneg %p2046_p12 }
  0x5b   : > { %p2052_p2 = pnand %p2050_p0, %p2047_p13 }
  0x5d   : > { %2055 = shalt.err (!%p2052_p2)
}
  0x5e   : > { %s2056_s22 = scalar_lea.vmem %s343_s27, 1024  ;;  %p2064_p5 = scmp.lt.s32.totalorder %s343_s27, %s343_s27 }
  0x5f   : > { %p2057_p4 = scmp.ne.s32.totalorder %s343_s27, %s2056_s22  ;;  %p2065_p10 = scmp.lt.s32.totalorder %s2056_s22, %s2056_s22 }
  0x61   : > { %p2059_p7 = pnand %p2057_p4, %p2395_p8  ;;  %p2066_p1 = por %p2065_p10, %p2064_p5 }
  0x63   : > { %p2060_p9 = pneg %p2059_p7 }
  0x65   : > { %p2067_p3 = pnand %p2066_p1, %p2060_p9 }
  0x67   : > { %2070 = shalt.err (!%p2067_p3)
}
  0x68   : > { %1851 = dma.hbm_to_vmem [thread:$0]  (!%p2379_p6), %s2839_s6, 1024, %s343_s27, [#allocation10], %s2262_s29, %s2262_s29, %s2263_s30  }
  0x69   : > { %s2264_s9 = smov [#allocation12]   ;;  %s2840_s8 = sld [smem:[#allocation27_spill]] }
  0x6a   : > { %s358_s10 = sshll.u32 %s2264_s9, 4  ;;  %s359_s10 = int_to_ptr.vmem [resolvable:$true] %s358_s10 }
  0x6f   : > { %s2071_s12 = scalar_lea.hbm %s2840_s8, 1024 }
  0x70   : > { %p2072_p1 = scmp.ne.s32.totalorder %s2840_s8, %s2071_s12  ;;  %p2078_p12 = scmp.lt.u32.totalorder %s2071_s12, %s2840_s8 }
  0x72   : > { %p2074_p3 = pnand %p2072_p1, %p2395_p8 }
  0x74   : > { %p2075_p11 = pneg %p2074_p3 }
  0x76   : > { %p2080_p13 = pnand %p2078_p12, %p2075_p11 }
  0x78   : > { %2083 = shalt.err (!%p2080_p13)
}
  0x79   : > { %s2084_s27 = scalar_lea.vmem %s359_s10, 1024  ;;  %p2092_p7 = scmp.lt.s32.totalorder %s359_s10, %s359_s10 }
  0x7a   : > { %p2085_p0 = scmp.ne.s32.totalorder %s359_s10, %s2084_s27  ;;  %p2093_p9 = scmp.lt.s32.totalorder %s2084_s27, %s2084_s27 }
  0x7c   : > { %p2087_p2 = pnand %p2085_p0, %p2395_p8  ;;  %p2094_p5 = por %p2093_p9, %p2092_p7 }
  0x7e   : > { %p2088_p4 = pneg %p2087_p2 }
  0x80   : > { %p2095_p10 = pnand %p2094_p5, %p2088_p4 }
  0x82   : > { %2098 = shalt.err (!%p2095_p10)
}
  0x83   : > { %1854 = dma.hbm_to_vmem [thread:$0]  (!%p2379_p6), %s2840_s8, 1024, %s359_s10, [#allocation13], %s2262_s29, %s2262_s29, %s2263_s30  }
  0x84   : > { %s1567_s23 = sadd.s32 4294967294, %s2257_s18   ;;  %s43_s21 = sadd.s32 1, %s2253_s17 }
  0x85   : > { %p45_p8 = scmp.ge.s32.totalorder %s43_s21, 2  ;;  %s52_s9 = sadd.s32 1, %s2245_s15 }
  0x86   : > { %p59_p1 = scmp.ne.s32.totalorder %s2245_s15, %s2241_s14  ;;  %p60_p3 = scmp.eq.s32.totalorder %s2257_s18, 0 }
  0x87   : > { %s2870_s21 = smov (%p45_p8, %s43_s21), 0  ;;  %p65_p12 = scmp.ne.s32.totalorder %s2241_s14, %s2237_s13 }
  0x88   : > { %2841 = sst [smem:[#allocation22_spill]] %s2870_s21  ;;  %p2496_p11 = por %p60_p3, %p59_p1 }
  0x89   : > { %s47_s29 = ssub.s32 %s2253_s17, %s2870_s21  ;;  %p285_p6 = scmp.eq.s32.totalorder %s2363_s19, 1 }
  0x8a   : > { %p50_p13 = scmp.eq.s32.totalorder %s47_s29, 0  ;;  %p2843_p0 = scmp.eq.s32.totalorder %s2363_s19, 0 }
  0x8b   : > { %p2511_p4 = por %p285_p6, %p59_p1  ;;  %p291_p7 = scmp.eq.s32.totalorder %s1567_s23, 1 }
  0x8c   : > { %p2507_p2 = por %p2843_p0, %p65_p12  ;;  %p1870_p5 = scmp.lt.s32.totalorder %s2257_s18, 2 }
  0x8d   : > { %s2845_s10 = scalar_select %p2511_p4, 1, 0 }
  0x8e   : > { %s2844_s30 = scalar_select %p2507_p2, 1, 0 }
  0x8f   : > { %s2516_s11 = scalar_select %p50_p13, %s2245_s15, %s52_s9  }
  0x90   : > { %p2518_p9 = por %p291_p7, %p65_p12  ;;  %s375_s24 = sand.u32 1, %s2245_s15  }
  0x91   : > { %s1575_s26 = sshll.u32 %s2253_s17, 6  ;;  %s2525_s28 = sshll.u32 %s375_s24, 2 }
  0x92   : > { %s2846_s12 = scalar_select %p2518_p9, 1, 0 }
  0x93   : > { %s2530_s25 = scalar_lea.hbm %s2809_s0, %s1575_s26  ;;  %s379_s7 = scalar_lea.vmem [#allocation3], %s2525_s28 }
  0x94   : > { %s387_s23 = sshll.u32 %s379_s7, 4  ;;  %p2535_p10 = pnand %p1870_p5, %p2496_p11  ;;  %s2539_s23 = int_to_ptr.vmem [resolvable:$true] %s387_s23 }
  0x95   : > { %s2544_s27 = scalar_lea.hbm %s2810_s1, %s1575_s26  ;;  %s376_s2 = scalar_lea.sflag [#allocation4], %s375_s24 }
  0x96   : > { %s2099_s4 = scalar_lea.hbm %s2530_s25, 64  ;;  %p2101_p1 = pneg %p2535_p10 }
  0x97   : > { %p2100_p8 = scmp.ne.s32.totalorder %s2530_s25, %s2099_s4  ;;  %s2104_s6 = scalar_lea.hbm %s2809_s0, 128 }
  0x98   : > { %p2105_p12 = scmp.lt.u32.totalorder %s2530_s25, %s2809_s0  ;;  %p2106_p6 = scmp.lt.u32.totalorder %s2104_s6, %s2099_s4 }
  0x99   : > { %p2102_p3 = pnand %p2101_p1, %p2100_p8  ;;  %p2108_p0 = scmp.lt.u32.totalorder %s2099_s4, %s2530_s25 }
  0x9a   : > { %p2107_p13 = por %p2106_p6, %p2105_p12 }
  0x9b   : > { %p2103_p11 = pneg %p2102_p3 }
  0x9c   : > { %p2109_p7 = por %p2108_p0, %p2107_p13 }
  0x9e   : > { %p2110_p5 = pnand %p2109_p7, %p2103_p11 }
  0xa0   : > { %2113 = shalt.err (!%p2110_p5)
}
  0xa1   : > { %s2114_s24 = scalar_lea.vmem %s2539_s23, 64  ;;  %s2265_s26 = smov [#allocation3]  }
  0xa2   : > { %p2115_p8 = scmp.ne.s32.totalorder %s2539_s23, %s2114_s24  ;;  %s2119_s29 = sshll.u32 %s2265_s26, 4  ;;  %s2120_s29 = int_to_ptr.vmem [resolvable:$false] %s2119_s29 }
  0xa3   : > { %s2121_s8 = scalar_lea.vmem %s2120_s29, 128  ;;  %p2122_p4 = scmp.lt.s32.totalorder %s2539_s23, %s2120_s29 }
  0xa4   : > { %p2117_p3 = pnand %p2115_p8, %p2101_p1  ;;  %p2123_p12 = scmp.lt.s32.totalorder %s2121_s8, %s2114_s24 }
  0xa6   : > { %p2118_p9 = pneg %p2117_p3  ;;  %p2124_p6 = por %p2123_p12, %p2122_p4 }
  0xa8   : > { %p2125_p13 = pnand %p2124_p6, %p2118_p9 }
  0xaa   : > { %2128 = shalt.err (!%p2125_p13)
}
  0xab   : > { %1858 = dma.hbm_to_vmem [thread:$0]  (!%p2535_p10), %s2530_s25, 64, %s2539_s23, %s376_s2  }
  0xac   : > { %s394_s4 = sand.u32 1, %s2257_s18   ;;  %s398_s6 = scalar_lea.vmem [#allocation6], %s2525_s28 }
  0xad   : > { %s405_s21 = sshll.u32 %s398_s6, 4  ;;  %s395_s22 = scalar_lea.sflag [#allocation7], %s394_s4  ;;  %s406_s21 = int_to_ptr.vmem [resolvable:$true] %s405_s21 }
  0xae   : > { %s2129_s16 = scalar_lea.hbm %s2544_s27, 64  ;;  %s2134_s26 = scalar_lea.hbm %s2810_s1, 128 }
  0xaf   : > { %p2130_p4 = scmp.ne.s32.totalorder %s2544_s27, %s2129_s16  ;;  %p2135_p0 = scmp.lt.u32.totalorder %s2544_s27, %s2810_s1 }
  0xb0   : > { %p2136_p7 = scmp.lt.u32.totalorder %s2134_s26, %s2129_s16  ;;  %p2138_p8 = scmp.lt.u32.totalorder %s2129_s16, %s2544_s27 }
  0xb1   : > { %p2132_p9 = pnand %p2130_p4, %p2101_p1 }
  0xb2   : > { %p2137_p5 = por %p2136_p7, %p2135_p0 }
  0xb3   : > { %p2133_p11 = pneg %p2132_p9 }
  0xb4   : > { %p2139_p3 = por %p2138_p8, %p2137_p5 }
  0xb6   : > { %p2140_p12 = pnand %p2139_p3, %p2133_p11 }
  0xb8   : > { %2143 = shalt.err (!%p2140_p12)
}
  0xb9   : > { %s2144_s2 = scalar_lea.vmem %s406_s21, 64  ;;  %s2266_s28 = smov [#allocation6]  }
  0xba   : > { %p2145_p6 = scmp.ne.s32.totalorder %s406_s21, %s2144_s2  ;;  %s2149_s25 = sshll.u32 %s2266_s28, 4  ;;  %s2150_s25 = int_to_ptr.vmem [resolvable:$false] %s2149_s25 }
  0xbb   : > { %s2151_s23 = scalar_lea.vmem %s2150_s25, 128  ;;  %p2152_p9 = scmp.lt.s32.totalorder %s406_s21, %s2150_s25 }
  0xbc   : > { %p2147_p13 = pnand %p2145_p6, %p2101_p1  ;;  %p2153_p2 = scmp.lt.s32.totalorder %s2151_s23, %s2144_s2 }
  0xbe   : > { %p2148_p4 = pneg %p2147_p13  ;;  %p2154_p0 = por %p2153_p2, %p2152_p9 }
  0xc0   : > { %p2155_p7 = pnand %p2154_p0, %p2148_p4 }
  0xc2   : > { %2158 = shalt.err (!%p2155_p7)
}
  0xc3   : > { %1861 = dma.hbm_to_vmem [thread:$0]  (!%p2535_p10), %s2544_s27, 64, %s406_s21, %s395_s22  }
  0xc4   : > { %p2848_p11 = scmp.ne.s32.totalorder %s2834_s20, 0 }
  0xc5   : > { %s2595_s4 = sand.u32 (!%p2848_p11), 1, %s2241_s14   ;;  %p2849_p2 = scmp.ne.s32.totalorder (!%p2848_p11), %s2844_s30, 0 }
  0xc6   : > { %414 = sbr.rel (%p2848_p11) target bundleno = 2556 (0x9fc), region = 60  ;;  %s1579_s6 = sshll.u32 (!%p2848_p11), %s2595_s4, 2 }
  0xc7   : > { %s417_s16 = scalar_lea.sflag (!%p2848_p11), [#allocation4], %s2595_s4  ;;  %s2599_s7 = scalar_lea.vmem (!%p2848_p11), [#allocation3], %s1579_s6 }
  0xcd   : > { %2212 = dma.done.wait (%p2849_p2), %s417_s16, 64  }
  0xce   : > { %2214 = vsyncadd (%p2849_p2), %s417_s16, 4294967232  ;;  %s425_s9 = sand.u32 1, %s2363_s19   ;;  %s2606_s27 = scalar_lea.vmem [#allocation6], %s1579_s6 }
  0xcf   : > { %s426_s20 = scalar_lea.sflag [#allocation7], %s425_s9 }
  0xd0   : > { %2216 = dma.done.wait (%p2849_p2), %s426_s20, 64  }
  0xd1   : > { %2218 = vsyncadd (%p2849_p2), %s426_s20, 4294967232  ;;  %p2850_p10 = scmp.eq.s32.totalorder %s2363_s19, 0 }
  0xd3   : > { %2220 = dma.done.wait (%p2850_p10), [#allocation7], 1024   ;;  %p2851_p1 = pmov %p2850_p10 }
  0xd5   : > { %2222 = vsyncadd (%p2851_p1), [#allocation7], 4294966272  ;;  %p2852_p5 = pmov %p2851_p1 }
  0xd6   : > { %p2853_p8 = pmov %p2851_p1 }
  0xd7   : > { %2224 = dma.done.wait (%p2852_p5), [#allocation10], 2048  }
  0xd8   : > { %2226 = vsyncadd (%p2853_p8), [#allocation10], 4294965248  ;;  %p2854_p3 = pmov %p2851_p1 }
  0xd9   : > { %p2855_p12 = pmov %p2851_p1 }
  0xda   : > { %2228 = dma.done.wait (%p2854_p3), [#allocation13], 1024  }
  0xdb   : > { %2230 = vsyncadd (%p2855_p12), [#allocation13], 4294966272  ;;  %v2267_v0 = vmov 0.0   ;;  %vm2268_vm0 = vmmov 0   ;;  %v1939_v1 = vld [vmem:[#allocation9] sm:$0xff]   ;;  %v1941_v3 = vld [vmem:[#allocation9 + $0x8] sm:$0xff]  }
  0xdc   : > { %1712 = vmatprep.subr.bf16.mxu1 %v2267_v0  ;;  %1692 = vmatprep.subr.bf16.mxu0 %v2267_v0  ;;  %v1940_v2 = vld [vmem:[#allocation8] sm:$0xff]   ;;  %v1942_v4 = vld [vmem:[#allocation8 + $0x8] sm:$0xff]   ;;  %v1943_v5 = vld [vmem:[#allocation9 + $0x10] sm:$0xff]   ;;  %vm828_vm1 = vcmask 64512   ;;  %s2269_s24 = smov 120   ;;  %s2856_s8 = sld [smem:[#allocation26_spill]] }
  0xdd   : > { %1728 = vmatprep.mubr.msk.bf16.mxu1 %vm2268_vm0, %v2267_v0  ;;  %1708 = vmatprep.mubr.msk.bf16.mxu0 %vm2268_vm0, %v2267_v0  ;;  %v1944_v6 = vld [vmem:[#allocation8 + $0x10] sm:$0xff]   ;;  %v1945_v7 = vld [vmem:[#allocation9 + $0x18] sm:$0xff]   ;;  %v1947_v9 = vld [vmem:[#allocation9 + $0x20] sm:$0xff]   ;;  %vm888_vm2 = vcmask 1043456   ;;  %s2270_s2 = smov 112   ;;  %s2271_s28 = smov 104  }
  0xde   : > { %1713 = vmatpush3.bf16.msra.mxu1 %v1939_v1  ;;  %1693 = vmatpush3.bf16.msra.mxu0 %v1940_v2  ;;  %v1946_v8 = vld [vmem:[#allocation8 + $0x18] sm:$0xff]   ;;  %v1948_v10 = vld [vmem:[#allocation8 + $0x20] sm:$0xff]   ;;  %v1949_v11 = vld [vmem:[#allocation9 + $0x28] sm:$0xff]   ;;  %s2272_s25 = smov 16   ;;  %s2273_s23 = smov 8   ;;  %vm935_vm3 = vcmask 60416  }
  0xdf   : > { %1714 = vmatprep.subr.bf16.mxu1 %v2267_v0  ;;  %1694 = vmatprep.subr.bf16.mxu0 %v2267_v0  ;;  %v1950_v12 = vld [vmem:[#allocation8 + $0x28] sm:$0xff]   ;;  %v1951_v13 = vld [vmem:[#allocation9 + $0x30] sm:$0xff]   ;;  %v1953_v15 = vld [vmem:[#allocation9 + $0x38] sm:$0xff]   ;;  %vm1057_vm4 = vcmask 126016   ;;  %vm1176_vm5 = vcmask 191616   ;;  %s2857_s6 = sld [smem:[#allocation21_spill]] }
  0xe0   : > { %v1952_v14 = vld [vmem:[#allocation8 + $0x30] sm:$0xff]   ;;  %v1954_v16 = vld [vmem:[#allocation8 + $0x38] sm:$0xff]   ;;  %v1955_v19 = vld [vmem:[#allocation11] sm:$0xff]   ;;  %s2275_s16 = smov 24   ;;  %vm1295_vm6 = vcmask 257216   ;;  %s2859_s26 = sld [smem:[#allocation29_spill]] }
  0xe1   : > { %v489_v17 = vld [vmem:[%s2606_s27] sm:$0xf]  ;;  %v488_v18 = vld [vmem:[%s2599_s7] sm:$0xf]  ;;  %v1956_v20 = vld [vmem:[#allocation11 + $0x8] sm:$0xff]   ;;  %s1585_s7 = sshll.u32 %s2595_s4, 3 }
  0xe2   : > { %1715 = vmatpush3.bf16.msra.mxu1 %v1941_v3  ;;  %1695 = vmatpush3.bf16.msra.mxu0 %v1942_v4  ;;  %v1957_v21 = vld [vmem:[#allocation11 + $0x10] sm:$0xff]   ;;  %v1958_v22 = vld [vmem:[#allocation11 + $0x18] sm:$0xff]   ;;  %v1959_v23 = vld [vmem:[#allocation11 + $0x20] sm:$0xff]   ;;  %s2858_s27 = sld [smem:[#allocation28_spill]]  ;;  %s486_s30 = scalar_lea.vmem [#allocation14], %s1585_s7 }
  0xe3   : > { %1716 = vmatprep.subr.bf16.mxu1 %v2267_v0  ;;  %1696 = vmatprep.subr.bf16.mxu0 %v2267_v0  ;;  %v1960_v24 = vld [vmem:[#allocation11 + $0x28] sm:$0xff]   ;;  %v1961_v25 = vld [vmem:[#allocation11 + $0x30] sm:$0xff]   ;;  %v1962_v26 = vld [vmem:[#allocation11 + $0x38] sm:$0xff]   ;;  %s1425_s21 = sshll.u32 %s486_s30, 4  ;;  %p2860_p13 = scmp.ne.s32.totalorder %s2845_s10, 0  ;;  %s2762_s21 = int_to_ptr.vmem [resolvable:$true] %s1425_s21 }
  0xe4   : > { %v1595_v27 = vld [vmem:[%s2814_s5] ss:$0 sm:$0xff] }
  0xe5   : > { %v1586_v28 = vld [vmem:[%s2812_s3] ss:$0 sm:$0xff]  ;;  %s1634_s19 = sshll.u32 %s2857_s6, 7 }
  0xe6   : > { %1717 = vmatpush3.bf16.msra.mxu1 %v1943_v5  ;;  %1697 = vmatpush3.bf16.msra.mxu0 %v1944_v6  ;;  %v1604_v52 = vld [vmem:[%s2856_s8] ss:$0 sm:$0xff]  ;;  %s2760_s29 = scalar_lea.hbm %s2859_s26, %s1634_s19  ;;  %s1411_s8 = scalar_lea.sflag [#allocation5], %s2595_s4 }
  0xe7   : > { %1718 = vmatprep.subr.bf16.mxu1 %v2267_v0  ;;  %1698 = vmatprep.subr.bf16.mxu0 %v2267_v0 }
  0xea   : > { %1719 = vmatpush3.bf16.msra.mxu1 %v1945_v7  ;;  %1699 = vmatpush3.bf16.msra.mxu0 %v1946_v8 }
  0xeb   : > { %1720 = vmatprep.subr.bf16.mxu1 %v2267_v0  ;;  %1700 = vmatprep.subr.bf16.mxu0 %v2267_v0 }
  0xee   : > { %1721 = vmatpush3.bf16.msra.mxu1 %v1947_v9  ;;  %1701 = vmatpush3.bf16.msra.mxu0 %v1948_v10 }
  0xef   : > { %1722 = vmatprep.subr.bf16.mxu1 %v2267_v0  ;;  %1702 = vmatprep.subr.bf16.mxu0 %v2267_v0 }
  0xf2   : > { %1723 = vmatpush3.bf16.msra.mxu1 %v1949_v11  ;;  %1703 = vmatpush3.bf16.msra.mxu0 %v1950_v12 }
  0xf3   : > { %1724 = vmatprep.subr.bf16.mxu1 %v2267_v0  ;;  %1704 = vmatprep.subr.bf16.mxu0 %v2267_v0 }
  0xf6   : > { %1725 = vmatpush3.bf16.msra.mxu1 %v1951_v13  ;;  %1705 = vmatpush3.bf16.msra.mxu0 %v1952_v14 }
  0xf7   : > { %1726 = vmatprep.subr.bf16.mxu1 %v2267_v0  ;;  %1706 = vmatprep.subr.bf16.mxu0 %v2267_v0 }
  0xfa   : > { %1727 = vmatpush3.bf16.msra.mxu1 %v1953_v15  ;;  %1707 = vmatpush3.bf16.msra.mxu0 %v1954_v16 }
  0xfb   : > { %1752 = vmatprep.subr.bf16.mxu1 %v2267_v0  ;;  %1732 = vmatprep.subr.bf16.mxu0 %v2267_v0 }
  0xfd   : > { %1729 = vmatmul.mubr.bf16.vlgmr.msra.gmra.mrb[0].mxu1 %v489_v17  ;;  %1709 = vmatmul.mubr.bf16.vlgmr.msra.gmra.mrb[0].mxu0 %v488_v18 }
  0xfe   : > { %1754 = vmatprep.mubr.msk.bf16.mxu1 %vm2268_vm0, %v2267_v0  ;;  %1748 = vmatprep.mubr.msk.bf16.mxu0 %vm2268_vm0, %v2267_v0 }
  0xff   : > { %1733 = vmatpush3.bf16.msra.mxu0 %v1955_v19 }
 0x100   : > { %1734 = vmatprep.subr.bf16.mxu0 %v2267_v0 }
 0x103   : > { %1735 = vmatpush3.bf16.msra.mxu0 %v1956_v20 }
 0x104   : > { %1736 = vmatprep.subr.bf16.mxu0 %v2267_v0 }
 0x107   : > { %1737 = vmatpush3.bf16.msra.mxu0 %v1957_v21 }
 0x108   : > { %1738 = vmatprep.subr.bf16.mxu0 %v2267_v0 }
 0x10b   : > { %1739 = vmatpush3.bf16.msra.mxu0 %v1958_v22 }
 0x10c   : > { %1740 = vmatprep.subr.bf16.mxu0 %v2267_v0 }
 0x10f   : > { %1741 = vmatpush3.bf16.msra.mxu0 %v1959_v23 }
 0x110   : > { %1742 = vmatprep.subr.bf16.mxu0 %v2267_v0 }
 0x113   : > { %1743 = vmatpush3.bf16.msra.mxu0 %v1960_v24 }
 0x114   : > { %1744 = vmatprep.subr.bf16.mxu0 %v2267_v0 }
 0x117   : > { %1745 = vmatpush3.bf16.msra.mxu0 %v1961_v25 }
 0x118   : > { %1746 = vmatprep.subr.bf16.mxu0 %v2267_v0 }
 0x11b   : > { %1747 = vmatpush3.bf16.msra.mxu0 %v1962_v26 }
 0x11c   : > { %1800 = vmatprep.subr.bf16.mxu0 %v2267_v0 }
 0x11e   : > { %1749 = vmatmul.mubr.bf16.vlgmr.msra.gmra.mrb[4].mxu0 %v489_v17 }
 0x11f   : > { %1816 = vmatprep.mubr.msk.bf16.mxu0 %vm2268_vm0, %v2267_v0 }
 0x1d0   : > { %v706_v29 = vpop.f32.mrb[0].mxu1  ;;  %v595_v32 = vpop.f32.mrb[0].mxu0 }
 0x1d1   : > { %v707_v30 = vadd.f32 %v1595_v27, %v706_v29  ;;  %v1730_v31 = vpop.f32.mrb[1].mxu1  ;;  %v596_v34 = vadd.f32 %v1586_v28, %v595_v32  ;;  %v1710_v35 = vpop.f32.mrb[1].mxu0 }
 0x1d2   : > { %v709_v33 = vpop.f32.mrb[2].mxu1  ;;  %v598_v38 = vpop.f32.mrb[2].mxu0 }
 0x1d3   : > { %v2668_v36 = vpack.c.bf16 %v707_v30, %v707_v30  ;;  %v1731_v37 = vpop.f32.mrb[3].mxu1  ;;  %v823_v39 = vmul.f32 0.35355338, %v596_v34  ;;  %v1711_v40 = vpop.f32.mrb[3].mxu0 }
 0x1d5   : > { %v833_v41 = vsel %vm828_vm1, %v2668_v36, 0  ;;  %v825_v42 = vpack.c.bf16 %v823_v39, %v823_v39 }
 0x1d6   : > { %1753 = vmatpush3.bf16.xpose.msra.mxu1 %v833_v41 }
 0x1d7   : > { %1758 = vmatprep.subr.bf16.mxu1 %v2267_v0  ;;  %938 = vrot.lane.b32.xlu1 %v825_v42, %s2269_s24 }
 0x1dd   : > { %1755 = vmatmul.mubr.msk.bf16.vlgmr.msra.gmra.mrb[4].mxu1 %vm828_vm1, %v825_v42 }
 0x1de   : > { %1760 = vmatprep.mubr.msk.bf16.mxu1 %vm2268_vm0, %v2267_v0 }
 0x1f1   : > { %v817_v43 = vpop.f32.mrb[4].mxu0 }
 0x1f2   : > { %v1750_v44 = vpop.f32.mrb[5].mxu0  ;;  %v818_v53 = vadd.f32 %v1604_v52, %v817_v43 }
 0x1f3   : > { %v820_v45 = vpop.f32.mrb[6].mxu0 }
 0x1f4   : > { %v1751_v46 = vpop.f32.mrb[7].mxu0  ;;  %v2680_v54 = vpack.c.bf16 %v818_v53, %v818_v53 }
 0x1f6   : > { %v890_v55 = vsel %vm888_vm2, %v2680_v54, 0 }
 0x1f7   : > { %1759 = vmatpush3.bf16.msra.mxu1 %v890_v55 }
 0x1f8   : > { %1764 = vmatprep.subr.bf16.mxu1 %v2267_v0 }
 0x249   : > { %v939_v2 = vpop.permute.xlu1 %938 }
 0x2b0   : > { %v869_v47 = vpop.f32.mrb[4].mxu1 }
 0x2b1   : > { %v1756_v48 = vpop.f32.mrb[5].mxu1  ;;  %v875_v49 = vsel %vm828_vm1, %v869_v47, -inf }
 0x2b2   : > { %876 = vmax.xlane.f32.xlu0 %v875_v49  ;;  %v872_v50 = vpop.f32.mrb[6].mxu1 }
 0x2b3   : > { %v1757_v51 = vpop.f32.mrb[7].mxu1 }
 0x2c8   : > { %941 = vrot.lane.b32.xlu0 %v2668_v36, %s2269_s24 }
 0x2cc   : > { %1000 = vrot.lane.b32.xlu0 %v2680_v54, %s2269_s24 }
 0x2d0   : > { %1061 = vrot.lane.b32.xlu0 %v2668_v36, %s2270_s2 }
 0x2d4   : > { %1059 = vrot.lane.b32.xlu0 %v825_v42, %s2270_s2 }
 0x33f   : > { %v877_v56 = vpop.xlane.xlu0 %876 }
 0x340   : > { %v878_v57 = vsub.f32 %v869_v47, %v877_v56 }
 0x342   : > { %v879_v58 = vmul.f32 1.442695, %v878_v57 }
 0x343   : > { %v942_v60 = vpop.permute.xlu0 %941 }
 0x344   : > { %1971 = vpow2.f32 %v879_v58  ;;  %v947_v62 = vsel %vm828_vm1, %v942_v60, 0 }
 0x347   : > { %v1001_v63 = vpop.permute.xlu0 %1000 }
 0x348   : > { %v1006_v1 = vsel %vm888_vm2, %v1001_v63, 0 }
 0x34b   : > { %v1062_v16 = vpop.permute.xlu0 %1061 }
 0x34c   : > { %v1067_v18 = vsel %vm828_vm1, %v1062_v16, 0 }
 0x34e   : > { %v2690_v59 = vpop.eup %1971 }
 0x34f   : > { %v884_v61 = vpack.c.bf16 %v2690_v59, %v2690_v59  ;;  %v1060_v20 = vpop.permute.xlu0 %1059 }
 0x351   : > { %1761 = vmatmul.mubr.msk.bf16.vlgmr.msra.gmra.mrb[8].mxu1 %vm828_vm1, %v884_v61 }
 0x352   : > { %1765 = vmatpush3.bf16.xpose.msra.mxu1 %v947_v62  ;;  %1766 = vmatprep.mubr.msk.bf16.mxu1 %vm2268_vm0, %v2267_v0 }
 0x353   : > { %1770 = vmatprep.subr.bf16.mxu1 %v2267_v0 }
 0x359   : > { %1767 = vmatmul.mubr.msk.bf16.vlgmr.msra.gmra.mrb[12].mxu1 %vm828_vm1, %v939_v2 }
 0x35a   : > { %1771 = vmatpush3.bf16.msra.mxu1 %v1006_v1  ;;  %1772 = vmatprep.mubr.msk.bf16.mxu1 %vm2268_vm0, %v2267_v0  ;;  %v881_v1 = vsel %vm828_vm1, %v2690_v59, 0.0  ;;  %v1966_v59 = vld [vmem:[#allocation12 + $0x18] sm:$0xff]  }
 0x35b   : > { %1776 = vmatprep.subr.bf16.mxu1 %v2267_v0 }
 0x424   : > { %v2704_v3 = vpop.f32.mrb[8].mxu1 }
 0x425   : > { %v1762_v4 = vpop.f32.mrb[9].mxu1 }
 0x426   : > { %v929_v5 = vpop.f32.mrb[10].mxu1 }
 0x427   : > { %v1763_v6 = vpop.f32.mrb[11].mxu1 }
 0x428   : > { %v2274_v6 = vmov 0  }
 0x429   : > { %824 = vst [vmem:[#allocation2] sm:$0xf] %v2274_v6 }
 0x42c   : > { %v983_v7 = vpop.f32.mrb[12].mxu1 }
 0x42d   : > { %v1768_v8 = vpop.f32.mrb[13].mxu1  ;;  %v989_v9 = vsel %vm828_vm1, %v983_v7, -inf }
 0x42e   : > { %990 = vmax.xlane.f32.xlu1 %v989_v9  ;;  %v986_v10 = vpop.f32.mrb[14].mxu1  ;;  %v1964_v8 = vld [vmem:[#allocation12 + $0x8] sm:$0xff]   ;;  %v1965_v9 = vld [vmem:[#allocation12 + $0x10] sm:$0xff]  }
 0x42f   : > { %v1769_v11 = vpop.f32.mrb[15].mxu1  ;;  %v1967_v10 = vld [vmem:[#allocation12 + $0x20] sm:$0xff]  }
 0x430   : > { %v1968_v11 = vld [vmem:[#allocation12 + $0x28] sm:$0xff]  }
 0x43f   : > { %1119 = vrot.lane.b32.xlu1 %v2680_v54, %s2270_s2  ;;  %s2159_s2 = scalar_lea.vmem %s2762_s21, 128 }
 0x440   : > { %p2160_p6 = scmp.ne.s32.totalorder %s2762_s21, %s2159_s2 }
 0x442   : > { %p2161_p4 = pnand %p2160_p6, %p2860_p13 }
 0x443   : > { %1180 = vrot.lane.b32.xlu1 %v2668_v36, %s2271_s28 }
 0x444   : > { %p2162_p9 = pneg %p2161_p4 }
 0x447   : > { %1178 = vrot.lane.b32.xlu1 %v825_v42, %s2271_s28 }
 0x4bb   : > { %v991_v12 = vpop.xlane.xlu1 %990 }
 0x4bc   : > { %v992_v13 = vsub.f32 %v983_v7, %v991_v12  ;;  %v1963_v7 = vld [vmem:[#allocation12] sm:$0xff]  }
 0x4bd   : > { %1801 = vmatpush3.bf16.msra.mxu0 %v1963_v7 }
 0x4be   : > { %v993_v14 = vmul.f32 1.442695, %v992_v13  ;;  %1802 = vmatprep.subr.bf16.mxu0 %v2267_v0 }
 0x4bf   : > { %v1120_v19 = vpop.permute.xlu1 %1119 }
 0x4c0   : > { %1973 = vpow2.f32 %v993_v14  ;;  %v1125_v21 = vsel %vm888_vm2, %v1120_v19, 0  ;;  %v1969_v19 = vld [vmem:[#allocation12 + $0x30] sm:$0xff]  }
 0x4c1   : > { %1803 = vmatpush3.bf16.msra.mxu0 %v1964_v8 }
 0x4c2   : > { %1804 = vmatprep.subr.bf16.mxu0 %v2267_v0 }
 0x4c3   : > { %v1181_v36 = vpop.permute.xlu1 %1180 }
 0x4c4   : > { %v1186_v38 = vsel %vm828_vm1, %v1181_v36, 0 }
 0x4c5   : > { %1805 = vmatpush3.bf16.msra.mxu0 %v1965_v9 }
 0x4c6   : > { %1806 = vmatprep.subr.bf16.mxu0 %v2267_v0 }
 0x4c7   : > { %v1179_v40 = vpop.permute.xlu1 %1178 }
 0x4c9   : > { %1807 = vmatpush3.bf16.msra.mxu0 %v1966_v59 }
 0x4ca   : > { %v1974_v15 = vpop.eup %1973  ;;  %1808 = vmatprep.subr.bf16.mxu0 %v2267_v0 }
 0x4cb   : > { %v998_v17 = vpack.c.bf16 %v1974_v15, %v1974_v15  ;;  %v995_v31 = vsel %vm828_vm1, %v1974_v15, 0.0 }
 0x4cd   : > { %1773 = vmatmul.mubr.msk.bf16.vlgmr.msra.gmra.mrb[16].mxu1 %vm828_vm1, %v998_v17  ;;  %1809 = vmatpush3.bf16.msra.mxu0 %v1967_v10 }
 0x4ce   : > { %1777 = vmatpush3.bf16.xpose.msra.mxu1 %v1067_v18  ;;  %1778 = vmatprep.mubr.msk.bf16.mxu1 %vm2268_vm0, %v2267_v0 }
 0x4cf   : > { %1782 = vmatprep.subr.bf16.mxu1 %v2267_v0  ;;  %1810 = vmatprep.subr.bf16.mxu0 %v2267_v0 }
 0x4d1   : > { %1811 = vmatpush3.bf16.msra.mxu0 %v1968_v11 }
 0x4d2   : > { %1812 = vmatprep.subr.bf16.mxu0 %v2267_v0 }
 0x4d5   : > { %1779 = vmatmul.mubr.msk.bf16.vlgmr.msra.gmra.mrb[20].mxu1 %vm828_vm1, %v1060_v20  ;;  %1813 = vmatpush3.bf16.msra.mxu0 %v1969_v19  ;;  %v1970_v20 = vld [vmem:[#allocation12 + $0x38] sm:$0xff]  }
 0x4d6   : > { %1783 = vmatpush3.bf16.msra.mxu1 %v1125_v21  ;;  %1784 = vmatprep.mubr.msk.bf16.mxu1 %vm2268_vm0, %v2267_v0 }
 0x4d7   : > { %1788 = vmatprep.subr.bf16.mxu1 %v2267_v0  ;;  %1814 = vmatprep.subr.bf16.mxu0 %v2267_v0 }
 0x4d9   : > { %1815 = vmatpush3.bf16.msra.mxu0 %v1970_v20 }
 0x5a0   : > { %v2722_v22 = vpop.f32.mrb[16].mxu1 }
 0x5a1   : > { %v1774_v23 = vpop.f32.mrb[17].mxu1 }
 0x5a2   : > { %v1045_v24 = vpop.f32.mrb[18].mxu1 }
 0x5a3   : > { %v1775_v25 = vpop.f32.mrb[19].mxu1 }
 0x5a8   : > { %v1103_v26 = vpop.f32.mrb[20].mxu1 }
 0x5a9   : > { %v1780_v27 = vpop.f32.mrb[21].mxu1  ;;  %v1109_v28 = vsel %vm828_vm1, %v1103_v26, -inf }
 0x5aa   : > { %1110 = vmax.xlane.f32.xlu0 %v1109_v28  ;;  %v1106_v29 = vpop.f32.mrb[22].mxu1 }
 0x5ab   : > { %v1781_v30 = vpop.f32.mrb[23].mxu1 }
 0x5c0   : > { %1238 = vrot.lane.b32.xlu0 %v2680_v54, %s2271_s28  ;;  %s2276_s28 = smov [#allocation14]  }
 0x5df   : > { %996 = vadd.xlane.f32.xlu0 %v995_v31 }
 0x637   : > { %v1111_v32 = vpop.xlane.xlu0 %1110 }
 0x638   : > { %v1112_v33 = vsub.f32 %v1103_v26, %v1111_v32 }
 0x63a   : > { %v1113_v34 = vmul.f32 1.442695, %v1112_v33 }
 0x63b   : > { %v1239_v39 = vpop.permute.xlu0 %1238 }
 0x63c   : > { %1975 = vpow2.f32 %v1113_v34  ;;  %v1244_v41 = vsel %vm888_vm2, %v1239_v39, 0 }
 0x646   : > { %v1976_v35 = vpop.eup %1975 }
 0x647   : > { %v1118_v37 = vpack.c.bf16 %v1976_v35, %v1976_v35  ;;  %v1115_v51 = vsel %vm828_vm1, %v1976_v35, 0.0 }
 0x649   : > { %1785 = vmatmul.mubr.msk.bf16.vlgmr.msra.gmra.mrb[24].mxu1 %vm828_vm1, %v1118_v37 }
 0x64a   : > { %1789 = vmatpush3.bf16.xpose.msra.mxu1 %v1186_v38  ;;  %1790 = vmatprep.mubr.msk.bf16.mxu1 %vm2268_vm0, %v2267_v0 }
 0x64b   : > { %1794 = vmatprep.subr.bf16.mxu1 %v2267_v0 }
 0x651   : > { %1791 = vmatmul.mubr.msk.bf16.vlgmr.msra.gmra.mrb[28].mxu1 %vm828_vm1, %v1179_v40 }
 0x652   : > { %1795 = vmatpush3.bf16.msra.mxu1 %v1244_v41  ;;  %1796 = vmatprep.mubr.msk.bf16.mxu1 %vm2268_vm0, %v2267_v0  ;;  %v1624_v0 = vld [vmem:[%s2858_s27] ss:$0 sm:$0xff] }
 0x66c   : > { %v997_v58 = vpop.xlane.xlu0 %996 }
 0x71c   : > { %v1161_v42 = vpop.f32.mrb[24].mxu1 }
 0x71d   : > { %v1786_v43 = vpop.f32.mrb[25].mxu1 }
 0x71e   : > { %v1164_v44 = vpop.f32.mrb[26].mxu1 }
 0x71f   : > { %v1787_v45 = vpop.f32.mrb[27].mxu1 }
 0x724   : > { %v1222_v46 = vpop.f32.mrb[28].mxu1 }
 0x725   : > { %v1792_v47 = vpop.f32.mrb[29].mxu1  ;;  %v1228_v48 = vsel %vm828_vm1, %v1222_v46, -inf }
 0x726   : > { %1229 = vmax.xlane.f32.xlu1 %v1228_v48  ;;  %v1225_v49 = vpop.f32.mrb[30].mxu1 }
 0x727   : > { %v1793_v50 = vpop.f32.mrb[31].mxu1 }
 0x72a   : > { %1116 = vadd.xlane.f32.xlu1 %v1115_v51 }
 0x7b3   : > { %v1230_v52 = vpop.xlane.xlu1 %1229 }
 0x7b4   : > { %v1231_v53 = vsub.f32 %v1222_v46, %v1230_v52 }
 0x7b6   : > { %v1232_v54 = vmul.f32 1.442695, %v1231_v53 }
 0x7b7   : > { %v1117_v55 = vpop.xlane.xlu1 %1116 }
 0x7b8   : > { %1977 = vpow2.f32 %v1232_v54 }
 0x7b9   : > { %1979 = vrcp.f32 %v1117_v55 }
 0x7ba   : > { %1981 = vrcp.f32 %v997_v58 }
 0x7c2   : > { %v1978_v56 = vpop.eup %1977 }
 0x7c3   : > { %v1980_v57 = vpop.eup %1979  ;;  %v1234_v60 = vsel %vm828_vm1, %v1978_v56, 0.0  ;;  %v1237_v61 = vpack.c.bf16 %v1978_v56, %v1978_v56 }
 0x7c4   : > { %1235 = vadd.xlane.f32.xlu1 %v1234_v60  ;;  %v1168_v62 = vmul.f32 %v1980_v57, %v1161_v42  ;;  %v1982_v2 = vpop.eup %1981 }
 0x7c5   : > { %1797 = vmatmul.mubr.msk.bf16.vlgmr.msra.gmra.mrb[32].mxu1 %vm828_vm1, %v1237_v61  ;;  %v1049_v4 = vmul.f32 %v1982_v2, %v2722_v22 }
 0x7c6   : > { %v1638_v63 = vpack.c.bf16 %v1168_v62, %v1168_v62 }
 0x7c7   : > { %v1637_v5 = vpack.c.bf16 %v1049_v4, %v1049_v4 }
 0x7c8   : > { %1173 = vrot.lane.b32.xlu0 %v1638_v63, %s2272_s25  ;;  %882 = vadd.xlane.f32.xlu1 %v881_v1  ;;  %s2163_s25 = sshll.u32 %s2276_s28, 4  ;;  %s2164_s25 = int_to_ptr.vmem [resolvable:$false] %s2163_s25 }
 0x7c9   : > { %p2166_p0 = scmp.lt.s32.totalorder %s2762_s21, %s2164_s25 }
 0x7d9   : > { %1054 = vrot.lane.b32.xlu1 %v1637_v5, %s2273_s23  ;;  %s2165_s23 = scalar_lea.vmem %s2164_s25, 256 }
 0x7da   : > { %p2167_p7 = scmp.lt.s32.totalorder %s2165_s23, %s2159_s2 }
 0x7dc   : > { %p2168_p11 = por %p2167_p7, %p2166_p0 }
 0x7de   : > { %p2169_p2 = pnand %p2168_p11, %p2162_p9 }
 0x83a   : > { %v1174_v18 = vpop.permute.xlu0 %1173 }
 0x851   : > { %v1236_v12 = vpop.xlane.xlu1 %1235 }
 0x855   : > { %v883_v13 = vpop.xlane.xlu1 %882 }
 0x856   : > { %1983 = vrcp.f32 %v883_v13 }
 0x857   : > { %1985 = vrcp.f32 %v1236_v12 }
 0x859   : > { %v1055_v17 = vpop.permute.xlu1 %1054 }
 0x860   : > { %v1984_v14 = vpop.eup %1983 }
 0x861   : > { %v933_v15 = vmul.f32 %v1984_v14, %v2704_v3  ;;  %v1986_v21 = vpop.eup %1985 }
 0x863   : > { %v934_v16 = vpack.c.bf16 %v933_v15, %v933_v15 }
 0x865   : > { %936 = vst.msk [vmem:[#allocation2] sm:$0xf] %vm935_vm3, %v934_v16 }
 0x866   : > { %1058 = vst.msk [vmem:[#allocation2] sm:$0xf] %vm1057_vm4, %v1055_v17 }
 0x867   : > { %1177 = vst.msk [vmem:[#allocation2] sm:$0xf] %vm1176_vm5, %v1174_v18 }
 0x898   : > { %v1280_v3 = vpop.f32.mrb[32].mxu1 }
 0x899   : > { %v1287_v22 = vmul.f32 %v1986_v21, %v1280_v3  ;;  %v1798_v23 = vpop.f32.mrb[33].mxu1 }
 0x89a   : > { %v1283_v24 = vpop.f32.mrb[34].mxu1 }
 0x89b   : > { %v1639_v25 = vpack.c.bf16 %v1287_v22, %v1287_v22  ;;  %v1799_v26 = vpop.f32.mrb[35].mxu1 }
 0x89d   : > { %1292 = vrot.lane.b32.xlu1 %v1639_v25, %s2275_s16 }
 0x90f   : > { %v1293_v27 = vpop.permute.xlu1 %1292 }
 0x910   : > { %1296 = vst.msk [vmem:[#allocation2] sm:$0xf] %vm1295_vm6, %v1293_v27 }
 0x917   : > { %v1297_v28 = vld [vmem:[#allocation2] sm:$0xf] }
 0x918   : > { %1817 = vmatmul.mubr.bf16.vlgmr.msra.gmra.mrb[8].mxu0 %v1297_v28 }
 0x9eb   : > { %v1403_v29 = vpop.f32.mrb[8].mxu0 }
 0x9ec   : > { %v1404_v30 = vadd.f32 %v1624_v0, %v1403_v29  ;;  %v1818_v31 = vpop.f32.mrb[9].mxu0 }
 0x9ed   : > { %v1406_v32 = vpop.f32.mrb[10].mxu0 }
 0x9ee   : > { %1409 = vst [vmem:[%s486_s30] sm:$0xff] %v1404_v30  ;;  %v1819_v33 = vpop.f32.mrb[11].mxu0 }
 0x9ef   : > { %2172 = shalt.err (!%p2169_p2)
}
 0x9f0   : > { %s2173_s4 = scalar_lea.hbm %s2760_s29, 128  ;;  %s2177_s7 = scalar_lea.hbm %s2859_s26, 256 }
 0x9f1   : > { %p2174_p10 = scmp.ne.s32.totalorder %s2760_s29, %s2173_s4  ;;  %p2178_p8 = scmp.lt.u32.totalorder %s2760_s29, %s2859_s26 }
 0x9f2   : > { %p2179_p3 = scmp.lt.u32.totalorder %s2177_s7, %s2173_s4  ;;  %p2181_p6 = scmp.lt.u32.totalorder %s2173_s4, %s2760_s29 }
 0x9f3   : > { %p2175_p1 = pnand %p2174_p10, %p2860_p13 }
 0x9f4   : > { %p2180_p12 = por %p2179_p3, %p2178_p8 }
 0x9f5   : > { %p2176_p5 = pneg %p2175_p1 }
 0x9f6   : > { %p2182_p4 = por %p2181_p6, %p2180_p12 }
 0x9f8   : > { %p2183_p9 = pnand %p2182_p4, %p2176_p5 }
 0x9fa   : > { %2186 = shalt.err (!%p2183_p9)
}
 0x9fb   : > { %1840 = dma.vmem_to_hbm [thread:$0]  (%p2860_p13), %s2762_s21, 128, %s2760_s29, %s1411_s8  }
 0x9fc PF: > { %s1437_s27 = sand.u32 1, %s2237_s13   ;;  %p2861_p0 = scmp.ne.s32.totalorder %s2846_s12, 0 }
 0x9fd   : > { %p2862_p7 = scmp.ge.s32.totalorder %s2257_s18, 2  ;;  %s1438_s19 = scalar_lea.sflag [#allocation5], %s1437_s27 }
 0x9ff   : > { %p1863_p11 = pnand %p2862_p7, %p2861_p0 }
 0xa01   : > { %2232 = dma.done.wait (!%p1863_p11), %s1438_s19, 128  }
 0xa02   : > { %2234 = vsyncadd (!%p1863_p11), %s1438_s19, 4294967168  ;;  %s31_s18 = sadd.s32 1, %s2257_s18   ;;  %s2863_s10 = sld [smem:[#allocation22_spill]] }
 0xa03   : > { %p28_p2 = scmp.ge.s32.totalorder %s31_s18, 4   ;;  %s2864_s13 = smov %s2241_s14 }
 0xa04   : > { %s2865_s14 = smov %s2245_s15  ;;  %s2866_s15 = smov %s2516_s11 }
 0xa05   : > { %s2867_s16 = smov %s2253_s17  ;;  %30 = sbr.rel (!%p28_p2) target bundleno = 18 (0x12), region = 134 }
 0xa08   : > { %s2868_s17 = smov %s2863_s10 }
 0xa0c   :  { %1443 = vsyncpa [#allocation4], 1 }
 0xa0d   :  { %1445 = vsyncpa [#allocation4 + $0x1], 1 }
 0xa0e   :  { %1446 = vsyncpa [#allocation7], 1 }
 0xa0f   :  { %1448 = vsyncpa [#allocation7 + $0x1], 1 }
 0xa10   :  { %1449 = vsyncpa [#allocation10], 1 }
 0xa11   :  { %1450 = vsyncpa [#allocation13], 1 }
 0xa12   :  { %1451 = vsyncpa [#allocation5], 1 }
 0xa13   :  { %1453 = vsyncpa [#allocation5 + $0x1], 1 }

</bundles_post_ra>
